<compile_context>
chip_gen: v5e
topology: v5e:2x2
jax: 0.10.0
libtpu: 0.0.40
codegen_flags: <defaults>
</compile_context>

<pallas_src>
import functools

import jax
import jax.numpy as jnp
from jax.experimental import pallas as pl
from jax.experimental.pallas import tpu as pltpu


def _round_up(v, m):
    return ((v + m - 1) // m) * m


def _fused_head_kernel(x_ref, w_ref, b_ref, out_ref):
    # One MXU matmul over the fused (lane-dense, 128-aligned) output slab,
    # f32 accumulate + f32 bias add, single unmasked store.
    out_ref[...] = (
        jnp.dot(x_ref[...], w_ref[...], preferred_element_type=jnp.float32)
        + b_ref[...]
    ).astype(out_ref.dtype)


def prepare_fused_params(params):
    """One-time parameter prep (hoisted out of the forward path).

    Takes PyTorch-layout params ((out, in) weights, (out,) biases) and returns
    a fused, pre-transposed, lane-padded weight slab + bias row plus the
    per-head output widths needed to slice the fused result.
    Output column order: [scores | attributes | bbox_deltas].
    """
    nc = params["cls_w"].shape[0]
    na = params["attr_w"].shape[0]
    nb = params["bbox_w"].shape[0]

    # (C, nc + na + nb) fused weight, (nc + na + nb,) fused bias.
    w_fused = jnp.concatenate(
        [params["cls_w"], params["attr_w"], params["bbox_w"]], axis=0
    ).T
    b_fused = jnp.concatenate(
        [params["cls_b"], params["attr_b"], params["bbox_b"]], axis=0
    )

    out_total = nc + na + nb
    out_pad = _round_up(out_total, 128)  # lane-dense, unmasked vst
    if out_pad != out_total:
        w_fused = jnp.pad(w_fused, ((0, 0), (0, out_pad - out_total)))
        b_fused = jnp.pad(b_fused, (0, out_pad - out_total))

    return {
        "w": w_fused,                      # (C, out_pad)
        "b": b_fused.reshape(1, -1),       # (1, out_pad)
        "nc": nc,
        "na": na,
        "nb": nb,
    }


@functools.partial(jax.jit, static_argnames=("nc", "na", "nb"))
def _fused_forward(x2, w, b, *, nc, na, nb):
    n, c = x2.shape
    out_pad = w.shape[1]

    # Row tiling: pad N to a multiple of 8 sublanes; tile at up to 128 rows
    # so the MXU sees full-height tiles and the last grid tile is unmasked.
    n8 = _round_up(max(n, 1), 8)
    tm = min(128, n8)
    n_pad = _round_up(n, tm)
    if n_pad != n:
        x2 = jnp.pad(x2, ((0, n_pad - n), (0, 0)))

    grid = (n_pad // tm,)

    itemsize = jnp.dtype(x2.dtype).itemsize
    # Resident weight + bias, double-buffered x and output tiles.
    vmem_bytes = itemsize * (c * out_pad + 2 * out_pad + 2 * tm * c + 2 * tm * out_pad)
    vmem_limit = int(min(max(2 * vmem_bytes, 16 << 20), 64 << 20))

    cost = pl.CostEstimate(
        flops=2 * n_pad * c * out_pad,
        transcendentals=0,
        bytes_accessed=itemsize * (n_pad * c + c * out_pad + out_pad + n_pad * out_pad),
    )

    out = pl.pallas_call(
        _fused_head_kernel,
        out_shape=jax.ShapeDtypeStruct((n_pad, out_pad), x2.dtype),
        grid_spec=pltpu.PrefetchScalarGridSpec(
            num_scalar_prefetch=0,
            grid=grid,
            in_specs=[
                pl.BlockSpec((tm, c), lambda i: (i, 0)),        # x: pipelined over rows
                pl.BlockSpec((c, out_pad), lambda i: (0, 0)),   # fused W: VMEM-resident
                pl.BlockSpec((1, out_pad), lambda i: (0, 0)),   # fused b: VMEM-resident
            ],
            out_specs=pl.BlockSpec((tm, out_pad), lambda i: (i, 0)),
        ),
        compiler_params=pltpu.CompilerParams(
            dimension_semantics=("parallel",),   # rows independent -> v7x 2-TC shard
            vmem_limit_bytes=vmem_limit,
        ),
        cost_estimate=cost,
    )(x2, w, b)

    scores = out[:n, :nc]
    attrs = out[:n, nc:nc + na]
    bbox = out[:n, nc + na:nc + na + nb]
    return scores, attrs, bbox


def fastrcnn_predictor(x, fused_params):
    """JAX wrapper reproducing CustomFastRCNNPredictor.forward.

    x: (N, C) or (N, C, 1, 1)
    fused_params: output of prepare_fused_params (call once, reuse).
    Returns (scores, attributes, bbox_deltas).
    """
    if x.ndim == 4:
        assert x.shape[2] == 1 and x.shape[3] == 1, "expected (N, C, 1, 1)"
    x2 = x.reshape(x.shape[0], -1)  # flatten(start_dim=1)
    return _fused_forward(
        x2,
        fused_params["w"],
        fused_params["b"],
        nc=fused_params["nc"],
        na=fused_params["na"],
        nb=fused_params["nb"],
    )


def init_params(key, in_channels, num_classes, num_attributes):
    """Deterministic synthetic init, shapes matching nn.Linear (out, in)."""
    ks = jax.random.split(key, 6)
    bound = 1.0 / jnp.sqrt(in_channels)
    u = lambda k, shape: jax.random.uniform(k, shape, jnp.float32, -bound, bound)
    return {
        "cls_w": u(ks[0], (num_classes, in_channels)),
        "cls_b": u(ks[1], (num_classes,)),
        "bbox_w": u(ks[2], (num_classes * 4, in_channels)),
        "bbox_b": u(ks[3], (num_classes * 4,)),
        "attr_w": u(ks[4], (num_attributes, in_channels)),
        "attr_b": u(ks[5], (num_attributes,)),
    }


if __name__ == "__main__":
    batch = 4
    in_channels = 64
    num_classes = 8
    num_attributes = 16

    key = jax.random.PRNGKey(0)
    kx, kp = jax.random.split(key)

    # RoI-pooled features as in the Fast R-CNN head: (N, C, 1, 1)
    x = jax.random.normal(kx, (batch, in_channels, 1, 1), jnp.float32)
    params = init_params(kp, in_channels, num_classes, num_attributes)

    # Parameter prep is done ONCE, outside the forward path.
    fused = prepare_fused_params(params)

    scores, attrs, bbox = fastrcnn_predictor(x, fused)
    jax.block_until_ready((scores, attrs, bbox))

    # Reference check in plain JAX (PyTorch semantics).
    x2 = x.reshape(batch, -1)
    ref_scores = x2 @ params["cls_w"].T + params["cls_b"]
    ref_attrs = x2 @ params["attr_w"].T + params["attr_b"]
    ref_bbox = x2 @ params["bbox_w"].T + params["bbox_b"]
    assert scores.shape == (batch, num_classes)
    assert attrs.shape == (batch, num_attributes)
    assert bbox.shape == (batch, num_classes * 4)
    assert jnp.allclose(scores, ref_scores, atol=1e-5)
    assert jnp.allclose(attrs, ref_attrs, atol=1e-5)
    assert jnp.allclose(bbox, ref_bbox, atol=1e-5)

    print("KERNEL_OK")
</pallas_src>

<mosaic_0001>
module attributes {stable_mosaic.version = 11 : i64} {
  func.func @_fused_head_kernel(%arg0: i32, %arg1: memref<8x64xf32, #tpu.memory_space<vmem>>, %arg2: memref<64x128xf32, #tpu.memory_space<vmem>>, %arg3: memref<1x128xf32, #tpu.memory_space<vmem>>, %arg4: memref<8x128xf32, #tpu.memory_space<vmem>>) attributes {dimension_semantics = [#tpu.dimension_semantics<parallel>], iteration_bounds = array<i64: 1>, scalar_prefetch = 0 : i64, scratch_operands = 0 : i64, tpu.core_type = #tpu.core_type<tc>, window_params = [{transform_indices = @transform_0, window_bounds = array<i64: 8, 64>}, {pipeline_mode = #tpu.pipeline_mode<synchronous>, transform_indices = @transform_1, window_bounds = array<i64: 64, 128>}, {pipeline_mode = #tpu.pipeline_mode<synchronous>, transform_indices = @transform_2, window_bounds = array<i64: 1, 128>}, {transform_indices = @transform_3, window_bounds = array<i64: 8, 128>}]} {
    %c0 = arith.constant 0 : index
    %c0_0 = arith.constant 0 : index
    %0 = vector.load %arg1[%c0, %c0_0] : memref<8x64xf32, #tpu.memory_space<vmem>>, vector<8x64xf32>
    %c0_1 = arith.constant 0 : index
    %c0_2 = arith.constant 0 : index
    %1 = vector.load %arg2[%c0_1, %c0_2] : memref<64x128xf32, #tpu.memory_space<vmem>>, vector<64x128xf32>
    %cst = arith.constant dense<0.000000e+00> : vector<8x128xf32>
    %2 = tpu.matmul %0, %1, %cst {dimension_numbers = #tpu.dot_dimension_numbers<[1], [0], [0], [1], [0, 0, 1, 1], [], []>} : vector<8x64xf32>, vector<64x128xf32>, vector<8x128xf32> -> vector<8x128xf32>
    %c0_3 = arith.constant 0 : index
    %c0_4 = arith.constant 0 : index
    %3 = vector.load %arg3[%c0_3, %c0_4] : memref<1x128xf32, #tpu.memory_space<vmem>>, vector<1x128xf32>
    %4 = vector.broadcast %3 : vector<1x128xf32> to vector<8x128xf32>
    %5 = arith.addf %2, %4 : vector<8x128xf32>
    %c0_5 = arith.constant 0 : index
    %c0_6 = arith.constant 0 : index
    %6 = vector.load %arg4[%c0_5, %c0_6] : memref<8x128xf32, #tpu.memory_space<vmem>>, vector<8x128xf32>
    tpu.vector_store %arg4[%c0_5, %c0_6], %5 {strides = array<i32>} : memref<8x128xf32, #tpu.memory_space<vmem>>, vector<8x128xf32>,
    return
  }
  func.func @transform_0(%arg0: i32) -> (i32, i32) {
    %c0_i32 = arith.constant 0 : i32
    %c0_i32_0 = arith.constant 0 : i32
    return %arg0, %c0_i32 : i32, i32
  }
  func.func @transform_1(%arg0: i32) -> (i32, i32) {
    %c0_i32 = arith.constant 0 : i32
    %c0_i32_0 = arith.constant 0 : i32
    %c0_i32_1 = arith.constant 0 : i32
    return %c0_i32, %c0_i32_0 : i32, i32
  }
  func.func @transform_2(%arg0: i32) -> (i32, i32) {
    %c0_i32 = arith.constant 0 : i32
    %c0_i32_0 = arith.constant 0 : i32
    %c0_i32_1 = arith.constant 0 : i32
    return %c0_i32, %c0_i32_0 : i32, i32
  }
  func.func @transform_3(%arg0: i32) -> (i32, i32) {
    %c0_i32 = arith.constant 0 : i32
    %c0_i32_0 = arith.constant 0 : i32
    return %arg0, %c0_i32 : i32, i32
  }
}

</mosaic_0001>

<bundles_post_ra>
// kernel: _fused_forward.1
= control target key start
LH: loop header
LB: loop body
LE: loop exit
PB: predicated region body
PF: predicated region fallthrough
CT: control target
= control target key end

     0   :  { %8 = vsyncpa [#allocation3], 0  ;;  %s104_s15 = smov [#allocation2]   ;;  %s105_s17 = smov 128   ;;  %s139_s0 = inlined_call_operand.vmem [shape: f32[8,64], index: 0, kind: input, shape index: {}]   ;;  %s140_s1 = inlined_call_operand.hbm [shape: f32[64,128], index: 1, kind: input, shape index: {}]   ;;  %s141_s2 = inlined_call_operand.vmem [shape: f32[1,128], index: 2, kind: input, shape index: {}]   ;;  %s142_s3 = inlined_call_operand.vmem [shape: f32[8,128], index: 3, kind: output, shape index: {}]  }
   0x1   :  { %s15_s14 = sshll.u32 %s140_s1, 4  ;;  %s17_s16 = sshll.u32 %s104_s15, 4  ;;  %s16_s14 = int_to_ptr.hbm [resolvable:$true] %s15_s14  ;;  %s18_s16 = int_to_ptr.vmem [resolvable:$true] %s17_s16 }
   0x2   :  { %s106_s18 = smov 8  }
   0x3   :  { %23 = dma.hbm_to_vmem [thread:$0]  %s16_s14, 1024, %s18_s16, [#allocation3], %s105_s17, %s105_s17, %s106_s18  }
   0x4   :  { %102 = dma.done.wait [#allocation3], 1024  }
   0x5   :  { %103 = vsyncadd [#allocation3], 4294966272  ;;  %v38_v0 = vld [vmem:[#allocation2 + $0x38] sm:$0xff]  ;;  %v37_v1 = vld [vmem:[#allocation2 + $0x30] sm:$0xff]  ;;  %vm43_vm0 = vcmask 523264  }
   0x6   :  { %55 = vmatpush.msra.mxu0 %v38_v0  ;;  %v36_v2 = vld [vmem:[#allocation2 + $0x28] sm:$0xff]  ;;  %v35_v3 = vld [vmem:[#allocation2 + $0x20] sm:$0xff]  ;;  %v34_v4 = vld [vmem:[#allocation2 + $0x18] sm:$0xff] }
   0x7   :  { %v33_v5 = vld [vmem:[#allocation2 + $0x10] sm:$0xff]  ;;  %v32_v6 = vld [vmem:[#allocation2 + $0x8] sm:$0xff]  ;;  %v31_v7 = vld [vmem:[#allocation2] sm:$0xff] }
   0x8   :  { %56 = vmatpush.msra.mxu0 %v37_v1  ;;  %v30_v8 = vld [vmem:[%s139_s0] sm:$0xff] }
   0x9   :  { %v77_v9 = vld [vmem:[%s141_s2] ss:$0 sm:$0xff] }
   0xa   :  { %57 = vmatpush.msra.mxu0 %v36_v2 }
   0xc   :  { %58 = vmatpush.msra.mxu0 %v35_v3 }
   0xe   :  { %59 = vmatpush.msra.mxu0 %v34_v4 }
  0x10   :  { %60 = vmatpush.msra.mxu0 %v33_v5 }
  0x12   :  { %61 = vmatpush.msra.mxu0 %v32_v6 }
  0x14   :  { %62 = vmatpush.msra.mxu0 %v31_v7 }
  0x15   :  { %73 = vmatmul.msk.f32.vlgmr.msra.gmra.mxu0 %vm43_vm0, %v30_v8 }
  0x92   :  { %v64_v10 = vpop.f32.mrf.mxu0 }
  0x93   :  { %v65_v11 = vadd.f32 %v77_v9, %v64_v10 }
  0x95   :  { %67 = vst [vmem:[%s142_s3] sm:$0xff] %v65_v11 }
  0x96   :  { %72 = vsyncpa [#allocation3], 1 }

</bundles_post_ra>
